<compile_context>
chip_gen: v7x
topology: tpu7x:2x2x1
jax: 0.10.0
libtpu: 0.0.40
codegen_flags: <defaults>
</compile_context>

<pallas_src>
import jax
import jax.numpy as jnp
from jax.experimental import pallas as pl
from jax.experimental.pallas import tpu as pltpu

STATE_DIM = 4            # CartPole-v1 observation dim
X_PAD = 8                # state dim padded to a full sublane tile (K=8)
ACTION_DIM = 2           # CartPole-v1 action dim
HIDDEN = 64
LANES = 128              # lane width; everything is padded to 128 lanes
HEADS = ACTION_DIM + 1   # fused [actor logits | critic value]

# ---- parameter-slab row layout (all offsets are multiples of 8 sublanes) ----
W1_ROW = 0                    # rows [0, 8)   (rows >= STATE_DIM are zero)
B1_ROW = 8                    # row  8
W2_ROW = 16                   # rows [16, 144)
B2_ROW = W2_ROW + LANES       # 144
WH_ROW = B2_ROW + 8           # 152, rows [152, 280)
BH_ROW = WH_ROW + LANES       # 280
SLAB_ROWS = BH_ROW + 8        # 288 rows -> (288, 128) f32 ~= 147 KiB


def policy_kernel(x_ref, p_ref, out_ref):
    x = x_ref[...]                                         # (TILE_B, 8)

    # Static, sublane-aligned views into the resident parameter slab.
    w1 = p_ref[W1_ROW:W1_ROW + X_PAD, :]                   # (8,   128) full tile
    b1 = p_ref[B1_ROW:B1_ROW + 1, :]                       # (1,   128)
    w2 = p_ref[W2_ROW:W2_ROW + LANES, :]                   # (128, 128)
    b2 = p_ref[B2_ROW:B2_ROW + 1, :]                       # (1,   128)
    wh = p_ref[WH_ROW:WH_ROW + LANES, :]                   # (128, 128)
    bh = p_ref[BH_ROW:BH_ROW + 1, :]                       # (1,   128)

    # fc1 + ReLU, fc2 + ReLU (padding rows/lanes are zero and stay exactly zero).
    h1 = jnp.maximum(jnp.dot(x, w1, preferred_element_type=jnp.float32) + b1, 0.0)
    h2 = jnp.maximum(jnp.dot(h1, w2, preferred_element_type=jnp.float32) + b2, 0.0)

    # Fused actor+critic head: lanes [0,2) = logits, lane 2 = value, lanes >=3 = 0.
    head = jnp.dot(h2, wh, preferred_element_type=jnp.float32) + bh   # (TILE_B, 128)

    lane = jax.lax.broadcasted_iota(jnp.int32, head.shape, 1)
    is_logit = lane < ACTION_DIM

    # Closed-form 2-logit softmax (no 128-lane cross-lane reductions):
    #   p_i = 1 / (1 + exp(l_other - l_i))
    # exp overflow -> inf -> reciprocal 0 (correct limit); underflow -> p = 1.
    logits = jnp.where(is_logit, head, 0.0)
    other = pltpu.roll(logits, 1, axis=1) + pltpu.roll(logits, LANES - 1, axis=1)
    probs = pl.reciprocal(1.0 + jnp.exp(other - logits), approx=False)

    # One lane-dense (TILE_B, 128) store: [probs | value | zeros].
    # head lanes >= HEADS are exact zeros, so a single select suffices.
    out_ref[...] = jnp.where(is_logit, probs, head)


def _round_up(n, m):
    return (n + m - 1) // m * m


def _pick_tile_b(bp, max_tile_b):
    """Largest multiple-of-8 divisor of bp that is <= max_tile_b, preferring
    a tile that yields >= 2 grid steps (v7x dual-TensorCore utilization)."""
    cap = min(bp, max_tile_b)
    divs = [d for d in range(8, cap + 1, 8) if bp % d == 0]   # nonempty: 8 | bp
    two_step = [d for d in divs if bp // d >= 2]
    return max(two_step) if two_step else max(divs)


def pack_params(params):
    """Pack w1,b1,w2,b2 and the fused [actor|critic] head into one (288,128) slab."""
    slab = jnp.zeros((SLAB_ROWS, LANES), jnp.float32)
    slab = slab.at[W1_ROW:W1_ROW + STATE_DIM, :HIDDEN].set(params["w1"])
    slab = slab.at[B1_ROW, :HIDDEN].set(params["b1"].reshape(HIDDEN))
    slab = slab.at[W2_ROW:W2_ROW + HIDDEN, :HIDDEN].set(params["w2"])
    slab = slab.at[B2_ROW, :HIDDEN].set(params["b2"].reshape(HIDDEN))
    wh = jnp.concatenate([params["wa"], params["wc"]], axis=1)   # (HIDDEN, HEADS)
    bh = jnp.concatenate([params["ba"], params["bc"]], axis=1)   # (1, HEADS)
    slab = slab.at[WH_ROW:WH_ROW + HIDDEN, :HEADS].set(wh)
    slab = slab.at[BH_ROW, :HEADS].set(bh.reshape(HEADS))
    return slab


def policy_forward(x, slab, *, max_tile_b=1024):
    """x: (B, STATE_DIM) f32. Returns (action_probs (B, ACTION_DIM), value (B, 1))."""
    B, D = x.shape
    Bp = _round_up(B, 8)                         # pad batch to sublane quantum only
    pad_rows = Bp - B
    pad_cols = X_PAD - D                         # pad features to a full 8-row tile
    if pad_rows or pad_cols:
        x = jnp.pad(x, ((0, pad_rows), (0, pad_cols)))

    tile_b = _pick_tile_b(Bp, max_tile_b)        # divisor of Bp, multiple of 8

    out = pl.pallas_call(
        policy_kernel,
        out_shape=jax.ShapeDtypeStruct((Bp, LANES), jnp.float32),
        grid_spec=pltpu.PrefetchScalarGridSpec(
            num_scalar_prefetch=0,
            grid=(Bp // tile_b,),
            in_specs=[
                pl.BlockSpec((tile_b, X_PAD), lambda i: (i, 0)),       # batch tile
                pl.BlockSpec((SLAB_ROWS, LANES), lambda i: (0, 0)),    # resident weights
            ],
            out_specs=pl.BlockSpec((tile_b, LANES), lambda i: (i, 0)),
        ),
        compiler_params=pltpu.CompilerParams(
            dimension_semantics=("parallel",)),   # grid >= 2 lets v7x use both TCs
    )(x, slab)

    res = out[:B, :HEADS]                         # single pass over the big slab
    return res[:, :ACTION_DIM], res[:, ACTION_DIM:HEADS]


def init_params(key):
    """Deterministic PyTorch-style (uniform +-1/sqrt(fan_in)) initialization."""
    def linear(k, fan_in, fan_out):
        kw, kb = jax.random.split(k)
        bound = 1.0 / jnp.sqrt(fan_in)
        w = jax.random.uniform(kw, (fan_in, fan_out), jnp.float32, -bound, bound)
        b = jax.random.uniform(kb, (1, fan_out), jnp.float32, -bound, bound)
        return w, b

    k1, k2, k3, k4 = jax.random.split(key, 4)
    w1, b1 = linear(k1, STATE_DIM, HIDDEN)
    w2, b2 = linear(k2, HIDDEN, HIDDEN)
    wa, ba = linear(k3, HIDDEN, ACTION_DIM)
    wc, bc = linear(k4, HIDDEN, 1)
    return dict(w1=w1, b1=b1, w2=w2, b2=b2, wa=wa, ba=ba, wc=wc, bc=bc)


def policy_forward_ref(x, p):
    h1 = jnp.maximum(x @ p["w1"] + p["b1"], 0.0)
    h2 = jnp.maximum(h1 @ p["w2"] + p["b2"], 0.0)
    probs = jax.nn.softmax(h2 @ p["wa"] + p["ba"], axis=-1)
    value = h2 @ p["wc"] + p["bc"]
    return probs, value


if __name__ == "__main__":
    key = jax.random.PRNGKey(0)
    k_params, k_x1, k_x2 = jax.random.split(key, 3)

    params = init_params(k_params)
    slab = pack_params(params)

    # Small acting batch (grid=(1,)) and a multi-tile batch (grid>=2).
    for B, k in ((8, k_x1), (48, k_x2)):
        x = jax.random.normal(k, (B, STATE_DIM), jnp.float32)
        probs, value = jax.block_until_ready(policy_forward(x, slab))

        probs_ref, value_ref = policy_forward_ref(x, params)
        assert probs.shape == (B, ACTION_DIM) and value.shape == (B, 1)
        assert jnp.allclose(probs, probs_ref, atol=1e-5, rtol=1e-5)
        assert jnp.allclose(value, value_ref, atol=1e-5, rtol=1e-5)
        assert jnp.allclose(jnp.sum(probs, axis=-1), 1.0, atol=1e-5)

    print("KERNEL_OK")
</pallas_src>

<mosaic_0001>
module attributes {stable_mosaic.version = 11 : i64} {
  func.func @policy_kernel(%arg0: i32, %arg1: memref<8x8xf32, #tpu.memory_space<vmem>>, %arg2: memref<288x128xf32, #tpu.memory_space<vmem>>, %arg3: memref<8x128xf32, #tpu.memory_space<vmem>>) attributes {dimension_semantics = [#tpu.dimension_semantics<parallel>], iteration_bounds = array<i64: 1>, scalar_prefetch = 0 : i64, scratch_operands = 0 : i64, tpu.core_type = #tpu.core_type<tc>, window_params = [{transform_indices = @transform_0, window_bounds = array<i64: 8, 8>}, {pipeline_mode = #tpu.pipeline_mode<synchronous>, transform_indices = @transform_1, window_bounds = array<i64: 288, 128>}, {transform_indices = @transform_2, window_bounds = array<i64: 8, 128>}]} {
    %c0 = arith.constant 0 : index
    %c0_0 = arith.constant 0 : index
    %0 = vector.load %arg1[%c0, %c0_0] : memref<8x8xf32, #tpu.memory_space<vmem>>, vector<8x8xf32>
    %c0_1 = arith.constant 0 : index
    %c0_2 = arith.constant 0 : index
    %1 = vector.load %arg2[%c0_1, %c0_2] : memref<288x128xf32, #tpu.memory_space<vmem>>, vector<8x128xf32>
    %c8 = arith.constant 8 : index
    %c0_3 = arith.constant 0 : index
    %2 = vector.load %arg2[%c8, %c0_3] : memref<288x128xf32, #tpu.memory_space<vmem>>, vector<1x128xf32>
    %c16 = arith.constant 16 : index
    %c0_4 = arith.constant 0 : index
    %3 = vector.load %arg2[%c16, %c0_4] : memref<288x128xf32, #tpu.memory_space<vmem>>, vector<128x128xf32>
    %c144 = arith.constant 144 : index
    %c0_5 = arith.constant 0 : index
    %4 = vector.load %arg2[%c144, %c0_5] : memref<288x128xf32, #tpu.memory_space<vmem>>, vector<1x128xf32>
    %c152 = arith.constant 152 : index
    %c0_6 = arith.constant 0 : index
    %5 = vector.load %arg2[%c152, %c0_6] : memref<288x128xf32, #tpu.memory_space<vmem>>, vector<128x128xf32>
    %c280 = arith.constant 280 : index
    %c0_7 = arith.constant 0 : index
    %6 = vector.load %arg2[%c280, %c0_7] : memref<288x128xf32, #tpu.memory_space<vmem>>, vector<1x128xf32>
    %cst = arith.constant dense<0.000000e+00> : vector<8x128xf32>
    %7 = tpu.matmul %0, %1, %cst {dimension_numbers = #tpu.dot_dimension_numbers<[1], [0], [0], [1], [0, 0, 1, 1], [], []>} : vector<8x8xf32>, vector<8x128xf32>, vector<8x128xf32> -> vector<8x128xf32>
    %8 = vector.broadcast %2 : vector<1x128xf32> to vector<8x128xf32>
    %9 = arith.addf %7, %8 : vector<8x128xf32>
    %cst_8 = arith.constant 0.000000e+00 : f32
    %10 = vector.broadcast %cst_8 : f32 to vector<8x128xf32>
    %11 = arith.maximumf %9, %10 : vector<8x128xf32>
    %cst_9 = arith.constant dense<0.000000e+00> : vector<8x128xf32>
    %12 = tpu.matmul %11, %3, %cst_9 {dimension_numbers = #tpu.dot_dimension_numbers<[1], [0], [0], [1], [0, 0, 1, 1], [], []>} : vector<8x128xf32>, vector<128x128xf32>, vector<8x128xf32> -> vector<8x128xf32>
    %13 = vector.broadcast %4 : vector<1x128xf32> to vector<8x128xf32>
    %14 = arith.addf %12, %13 : vector<8x128xf32>
    %cst_10 = arith.constant 0.000000e+00 : f32
    %15 = vector.broadcast %cst_10 : f32 to vector<8x128xf32>
    %16 = arith.maximumf %14, %15 : vector<8x128xf32>
    %cst_11 = arith.constant dense<0.000000e+00> : vector<8x128xf32>
    %17 = tpu.matmul %16, %5, %cst_11 {dimension_numbers = #tpu.dot_dimension_numbers<[1], [0], [0], [1], [0, 0, 1, 1], [], []>} : vector<8x128xf32>, vector<128x128xf32>, vector<8x128xf32> -> vector<8x128xf32>
    %18 = vector.broadcast %6 : vector<1x128xf32> to vector<8x128xf32>
    %19 = arith.addf %17, %18 : vector<8x128xf32>
    %20 = tpu.iota {dimensions = array<i32: 1>} : vector<8x128xi32>
    %c2_i32 = arith.constant 2 : i32
    %21 = vector.broadcast %c2_i32 : i32 to vector<8x128xi32>
    %22 = arith.cmpi slt, %20, %21 : vector<8x128xi32>
    %cst_12 = arith.constant 0.000000e+00 : f32
    %23 = vector.broadcast %cst_12 : f32 to vector<8x128xf32>
    %24 = arith.select %22, %19, %23 : vector<8x128xi1>, vector<8x128xf32>
    %c1_i32 = arith.constant 1 : i32
    %25 = tpu.dynamic_rotate %24 by %c1_i32 dim 1 : vector<8x128xf32>, i32 -> vector<8x128xf32>
    %c127_i32 = arith.constant 127 : i32
    %26 = tpu.dynamic_rotate %24 by %c127_i32 dim 1 : vector<8x128xf32>, i32 -> vector<8x128xf32>
    %27 = arith.addf %25, %26 : vector<8x128xf32>
    %28 = arith.subf %27, %24 : vector<8x128xf32>
    %29 = math.exp %28 : vector<8x128xf32>
    %cst_13 = arith.constant 1.000000e+00 : f32
    %30 = vector.broadcast %cst_13 : f32 to vector<8x128xf32>
    %31 = arith.addf %30, %29 : vector<8x128xf32>
    %32 = tpu.reciprocal %31 : vector<8x128xf32> -> vector<8x128xf32>
    %33 = arith.select %22, %32, %19 : vector<8x128xi1>, vector<8x128xf32>
    %c0_14 = arith.constant 0 : index
    %c0_15 = arith.constant 0 : index
    %34 = vector.load %arg3[%c0_14, %c0_15] : memref<8x128xf32, #tpu.memory_space<vmem>>, vector<8x128xf32>
    tpu.vector_store %arg3[%c0_14, %c0_15], %33 {strides = array<i32>} : memref<8x128xf32, #tpu.memory_space<vmem>>, vector<8x128xf32>,
    return
  }
  func.func @transform_0(%arg0: i32) -> (i32, i32) {
    %c0_i32 = arith.constant 0 : i32
    %c0_i32_0 = arith.constant 0 : i32
    return %arg0, %c0_i32 : i32, i32
  }
  func.func @transform_1(%arg0: i32) -> (i32, i32) {
    %c0_i32 = arith.constant 0 : i32
    %c0_i32_0 = arith.constant 0 : i32
    %c0_i32_1 = arith.constant 0 : i32
    return %c0_i32, %c0_i32_0 : i32, i32
  }
  func.func @transform_2(%arg0: i32) -> (i32, i32) {
    %c0_i32 = arith.constant 0 : i32
    %c0_i32_0 = arith.constant 0 : i32
    return %arg0, %c0_i32 : i32, i32
  }
}

</mosaic_0001>

<bundles_post_ra>
// kernel: tpu_custom_call.1
= control target key start
LH: loop header
LB: loop body
LE: loop exit
PB: predicated region body
PF: predicated region fallthrough
CT: control target
= control target key end

     0   :  { %7 = vsyncpa [#allocation3], 0  ;;  %s673_s0 = inlined_call_operand.hbm [shape: f32[8,8], index: 0, kind: input, shape index: {}]   ;;  %s674_s1 = inlined_call_operand.hbm [shape: f32[288,128], index: 1, kind: input, shape index: {}]   ;;  %s675_s2 = inlined_call_operand.hbm [shape: f32[8,128], index: 2, kind: output, shape index: {}]  }
   0x1   :  { %8 = vsyncpa [#allocation6], 0 }
   0x2   :  { %9 = vsyncpa [#allocation4], 0  ;;  %s584_s9 = smov [#allocation2]   ;;  %s585_s11 = smov [#allocation5]  }
   0x3   :  { %s16_s10 = sshll.u32 %s584_s9, 4  ;;  %s25_s12 = sshll.u32 %s585_s11, 4  ;;  %s17_s10 = int_to_ptr.vmem [resolvable:$true] %s16_s10  ;;  %s609_s12 = int_to_ptr.vmem [resolvable:$true] %s25_s12 }
   0x4   :  { %s512_s15 = scalar_lea.hbm %s673_s0, 128 }
   0x5   :  { %p513_p0 = scmp.ne.s32.totalorder %s673_s0, %s512_s15  ;;  %p516_p1 = scmp.lt.u32.totalorder %s512_s15, %s673_s0 }
   0x7   :  { %p518_p2 = pnand %p516_p1, %p513_p0 }
   0x9   :  { %521 = shalt.err (!%p518_p2)
}
   0xa   :  { %s522_s20 = scalar_lea.vmem %s17_s10, 128  ;;  %p527_p4 = scmp.lt.s32.totalorder %s17_s10, %s17_s10 }
   0xb   :  { %p523_p3 = scmp.ne.s32.totalorder %s17_s10, %s522_s20  ;;  %p528_p5 = scmp.lt.s32.totalorder %s522_s20, %s522_s20 }
   0xd   :  { %p529_p6 = por %p528_p5, %p527_p4 }
   0xf   :  { %p530_p7 = pnand %p529_p6, %p523_p3 }
  0x11   :  { %533 = shalt.err (!%p530_p7)
}
  0x12   :  { %19 = dma.hbm_to_vmem [thread:$0]  %s673_s0, 128, %s17_s10, [#allocation3]  }
  0x13   :  { %s534_s25 = scalar_lea.hbm %s674_s1, 4608 }
  0x14   :  { %p535_p8 = scmp.ne.s32.totalorder %s674_s1, %s534_s25  ;;  %p538_p9 = scmp.lt.u32.totalorder %s534_s25, %s674_s1 }
  0x16   :  { %p540_p10 = pnand %p538_p9, %p535_p8 }
  0x18   :  { %543 = shalt.err (!%p540_p10)
}
  0x19   :  { %s544_s30 = scalar_lea.vmem %s609_s12, 4608  ;;  %p549_p12 = scmp.lt.s32.totalorder %s609_s12, %s609_s12 }
  0x1a   :  { %p545_p11 = scmp.ne.s32.totalorder %s609_s12, %s544_s30  ;;  %p550_p13 = scmp.lt.s32.totalorder %s544_s30, %s544_s30 }
  0x1c   :  { %p551_p0 = por %p550_p13, %p549_p12 }
  0x1e   :  { %p552_p1 = pnand %p551_p0, %p545_p11 }
  0x20   :  { %555 = shalt.err (!%p552_p1)
}
  0x21   :  { %s586_s0 = smov 128   ;;  %s587_s3 = smov 8  }
  0x22   :  { %31 = dma.hbm_to_vmem [thread:$0]  %s674_s1, 4608, %s609_s12, [#allocation6], %s586_s0, %s586_s0, %s587_s3  }
  0x23   :  { %578 = dma.done.wait [#allocation3], 128  }
  0x24   :  { %579 = vsyncadd [#allocation3], 4294967168 }
  0x25   :  { %580 = dma.done.wait [#allocation6], 4608  }
  0x26   :  { %581 = vsyncadd [#allocation6], 4294962688  ;;  %v588_v0 = vmov 0.0   ;;  %vm589_vm0 = vmmov 0   ;;  %v590_v1 = vmov 0.0|0.0   ;;  %vm79_vm1 = vcmask 64512  }
  0x27   :  { %375 = vmatprep.subr.mxu0 %v588_v0  ;;  %377 = vmatprep.mubr.msk.f32.mxu0 %vm589_vm0, %v588_v0  ;;  %v39_v2 = vld [vmem:[#allocation5] sm:$0xff]  ;;  %v38_v3 = vld [vmem:[#allocation2] sm:$0xff]  ;;  %v41_v4 = vld [vmem:[#allocation5 + $0x10] sm:$0xff]  ;;  %v303_v62 = vlaneseq  ;;  %s591_s1 = smov 1   ;;  %s592_s6 = smov 127  }
  0x28   :  { %450 = vmatprep.subr.bf16.mxu1 %v590_v1  ;;  %412 = vmatprep.mubr.msk.f32.mxu1 %vm589_vm0, %v588_v0  ;;  %v42_v5 = vld [vmem:[#allocation5 + $0x18] sm:$0xff]  ;;  %v43_v6 = vld [vmem:[#allocation5 + $0x20] sm:$0xff]  ;;  %v44_v7 = vld [vmem:[#allocation5 + $0x28] sm:$0xff]  ;;  %s593_s7 = smov [#allocation7]  }
  0x29   :  { %376 = vmatpush3.msra.mxu0 %v39_v2  ;;  %v451_v8 = vpack.c.bf16 %v42_v5, %v41_v4  ;;  %v454_v9 = vpack.c.bf16 %v44_v7, %v43_v6  ;;  %v45_v10 = vld [vmem:[#allocation5 + $0x30] sm:$0xff]  ;;  %v46_v11 = vld [vmem:[#allocation5 + $0x38] sm:$0xff]  ;;  %v47_v13 = vld [vmem:[#allocation5 + $0x40] sm:$0xff]  ;;  %v304_v63 = vand.u32 127, %v303_v62  ;;  %s325_s8 = sshll.u32 %s593_s7, 4  ;;  %s326_s8 = int_to_ptr.vmem [resolvable:$true] %s325_s8 }
  0x2a   :  { %378 = vmatmul.mubr.msk.f32.vlgmr.msra.gmra.mrb[0].mxu0 %vm79_vm1, %v38_v3  ;;  %474 = vmatprep.subr.bf16.mxu0 %v590_v1  ;;  %v457_v12 = vpack.c.bf16 %v46_v11, %v45_v10  ;;  %v48_v14 = vld [vmem:[#allocation5 + $0x48] sm:$0xff]  ;;  %v49_v16 = vld [vmem:[#allocation5 + $0x50] sm:$0xff]  ;;  %v50_v17 = vld [vmem:[#allocation5 + $0x58] sm:$0xff]  ;;  %s556_s9 = scalar_lea.vmem %s326_s8, 128  ;;  %p561_p3 = scmp.lt.s32.totalorder %s326_s8, %s326_s8 }
  0x2b   :  { %447 = vmatprep.mubr.msk.f32.mxu0 %vm589_vm0, %v588_v0  ;;  %452 = vmatpush3.bf16.msra.mxu1 %v451_v8  ;;  %v460_v15 = vpack.c.bf16 %v48_v14, %v47_v13  ;;  %v463_v18 = vpack.c.bf16 %v50_v17, %v49_v16  ;;  %v51_v19 = vld [vmem:[#allocation5 + $0x60] sm:$0xff]  ;;  %v52_v20 = vld [vmem:[#allocation5 + $0x68] sm:$0xff]  ;;  %v53_v22 = vld [vmem:[#allocation5 + $0x70] sm:$0xff]  ;;  %vm305_vm2 = vcmp.lt.s32.totalorder %v304_v63, 2  ;;  %p557_p2 = scmp.ne.s32.totalorder %s326_s8, %s556_s9  ;;  %p562_p4 = scmp.lt.s32.totalorder %s556_s9, %s556_s9 }
  0x2c   :  { %453 = vmatprep.subr.bf16.mxu1 %v590_v1  ;;  %v466_v21 = vpack.c.bf16 %v52_v20, %v51_v19  ;;  %v54_v23 = vld [vmem:[#allocation5 + $0x78] sm:$0xff]  ;;  %v55_v25 = vld [vmem:[#allocation5 + $0x80] sm:$0xff]  ;;  %v56_v26 = vld [vmem:[#allocation5 + $0x88] sm:$0xff] }
  0x2d   :  { %v469_v24 = vpack.c.bf16 %v54_v23, %v53_v22  ;;  %v472_v27 = vpack.c.bf16 %v56_v26, %v55_v25  ;;  %v58_v28 = vld [vmem:[#allocation5 + $0x98] sm:$0xff]  ;;  %v59_v29 = vld [vmem:[#allocation5 + $0xa0] sm:$0xff]  ;;  %v60_v30 = vld [vmem:[#allocation5 + $0xa8] sm:$0xff]  ;;  %p563_p5 = por %p562_p4, %p561_p3 }
  0x2e   :  { %v475_v31 = vpack.c.bf16 %v59_v29, %v58_v28  ;;  %v61_v32 = vld [vmem:[#allocation5 + $0xb0] sm:$0xff]  ;;  %v62_v34 = vld [vmem:[#allocation5 + $0xb8] sm:$0xff]  ;;  %v63_v35 = vld [vmem:[#allocation5 + $0xc0] sm:$0xff] }
  0x2f   :  { %455 = vmatpush3.bf16.msra.mxu1 %v454_v9  ;;  %v478_v33 = vpack.c.bf16 %v61_v32, %v60_v30  ;;  %v481_v36 = vpack.c.bf16 %v63_v35, %v62_v34  ;;  %v64_v37 = vld [vmem:[#allocation5 + $0xc8] sm:$0xff]  ;;  %v65_v38 = vld [vmem:[#allocation5 + $0xd0] sm:$0xff]  ;;  %v66_v40 = vld [vmem:[#allocation5 + $0xd8] sm:$0xff]  ;;  %p564_p6 = pnand %p563_p5, %p557_p2 }
  0x30   :  { %456 = vmatprep.subr.bf16.mxu1 %v590_v1  ;;  %476 = vmatpush3.bf16.msra.mxu0 %v475_v31  ;;  %v484_v39 = vpack.c.bf16 %v65_v38, %v64_v37  ;;  %v67_v41 = vld [vmem:[#allocation5 + $0xe0] sm:$0xff]  ;;  %v68_v43 = vld [vmem:[#allocation5 + $0xe8] sm:$0xff]  ;;  %v69_v44 = vld [vmem:[#allocation5 + $0xf0] sm:$0xff] }
  0x31   :  { %477 = vmatprep.subr.bf16.mxu0 %v590_v1  ;;  %v487_v42 = vpack.c.bf16 %v67_v41, %v66_v40  ;;  %v490_v45 = vpack.c.bf16 %v69_v44, %v68_v43  ;;  %v70_v46 = vld [vmem:[#allocation5 + $0xf8] sm:$0xff]  ;;  %v71_v47 = vld [vmem:[#allocation5 + $0x100] sm:$0xff]  ;;  %v335_v49 = vld [vmem:[#allocation5 + $0x8] ss:$0 sm:$0xff] }
  0x32   :  { %v493_v48 = vpack.c.bf16 %v71_v47, %v70_v46  ;;  %v72_v54 = vld [vmem:[#allocation5 + $0x108] sm:$0xff]  ;;  %v73_v55 = vld [vmem:[#allocation5 + $0x110] sm:$0xff]  ;;  %v338_v0 = vld [vmem:[#allocation5 + $0x118] ss:$0 sm:$0xff] }
  0x33   :  { %458 = vmatpush3.bf16.msra.mxu1 %v457_v12  ;;  %v496_v56 = vpack.c.bf16 %v73_v55, %v72_v54  ;;  %v337_v57 = vld [vmem:[#allocation5 + $0x90] ss:$0 sm:$0xff] }
  0x34   :  { %459 = vmatprep.subr.bf16.mxu1 %v590_v1  ;;  %479 = vmatpush3.bf16.msra.mxu0 %v478_v33 }
  0x35   :  { %480 = vmatprep.subr.bf16.mxu0 %v590_v1 }
  0x37   :  { %461 = vmatpush3.bf16.msra.mxu1 %v460_v15 }
  0x38   :  { %462 = vmatprep.subr.bf16.mxu1 %v590_v1  ;;  %482 = vmatpush3.bf16.msra.mxu0 %v481_v36 }
  0x39   :  { %483 = vmatprep.subr.bf16.mxu0 %v590_v1 }
  0x3b   :  { %464 = vmatpush3.bf16.msra.mxu1 %v463_v18 }
  0x3c   :  { %465 = vmatprep.subr.bf16.mxu1 %v590_v1  ;;  %485 = vmatpush3.bf16.msra.mxu0 %v484_v39 }
  0x3d   :  { %486 = vmatprep.subr.bf16.mxu0 %v590_v1 }
  0x3f   :  { %467 = vmatpush3.bf16.msra.mxu1 %v466_v21 }
  0x40   :  { %468 = vmatprep.subr.bf16.mxu1 %v590_v1  ;;  %488 = vmatpush3.bf16.msra.mxu0 %v487_v42 }
  0x41   :  { %489 = vmatprep.subr.bf16.mxu0 %v590_v1 }
  0x43   :  { %470 = vmatpush3.bf16.msra.mxu1 %v469_v24 }
  0x44   :  { %471 = vmatprep.subr.bf16.mxu1 %v590_v1  ;;  %491 = vmatpush3.bf16.msra.mxu0 %v490_v45 }
  0x45   :  { %492 = vmatprep.subr.bf16.mxu0 %v590_v1 }
  0x47   :  { %473 = vmatpush3.bf16.msra.mxu1 %v472_v27 }
  0x48   :  { %494 = vmatpush3.bf16.msra.mxu0 %v493_v48 }
  0x49   :  { %495 = vmatprep.subr.bf16.mxu0 %v590_v1 }
  0x4c   :  { %497 = vmatpush3.bf16.msra.mxu0 %v496_v56 }
  0xfd   :  { %v149_v50 = vpop.f32.mrb[0].mxu0 }
  0xfe   :  { %v150_v51 = vadd.f32 %v335_v49, %v149_v50  ;;  %v379_v52 = vpop.f32.mrb[1].mxu0 }
 0x100   :  { %v153_v53 = vmax.f32 %v150_v51, 0.0 }
 0x102   :  { %413 = vmatmul.mubr.f32.vlgmr.msra.gmra.mrb[0].mxu1 %v153_v53 }
 0x1d5   :  { %v224_v58 = vpop.f32.mrb[0].mxu1 }
 0x1d6   :  { %v225_v59 = vadd.f32 %v337_v57, %v224_v58  ;;  %v414_v60 = vpop.f32.mrb[1].mxu1 }
 0x1d8   :  { %v228_v61 = vmax.f32 %v225_v59, 0.0 }
 0x1da   :  { %448 = vmatmul.mubr.f32.vlgmr.msra.gmra.mrb[2].mxu0 %v228_v61 }
 0x2ad   :  { %v299_v1 = vpop.f32.mrb[2].mxu0 }
 0x2ae   :  { %v300_v2 = vadd.f32 %v338_v0, %v299_v1  ;;  %v449_v3 = vpop.f32.mrb[3].mxu0 }
 0x2b0   :  { %v306_v4 = vsel %vm305_vm2, %v300_v2, 0.0 }
 0x2b1   :  { %307 = vrot.lane.b32.xlu0 %v306_v4, %s591_s1 }
 0x2b5   :  { %309 = vrot.lane.b32.xlu0 %v306_v4, %s592_s6 }
 0x323   :  { %v308_v5 = vpop.permute.xlu0 %307 }
 0x327   :  { %v310_v6 = vpop.permute.xlu0 %309 }
 0x328   :  { %v311_v7 = vadd.f32 %v310_v6, %v308_v5 }
 0x32a   :  { %v312_v8 = vsub.f32 %v311_v7, %v306_v4 }
 0x32c   :  { %v313_v9 = vmul.f32 1.442695, %v312_v8 }
 0x32e   :  { %508 = vpow2.f32 %v313_v9 }
 0x338   :  { %v509_v10 = vpop.eup %508 }
 0x339   :  { %v315_v11 = vadd.f32 1.0, %v509_v10 }
 0x33b   :  { %510 = vrcp.f32 %v315_v11 }
 0x345   :  { %v511_v12 = vpop.eup %510 }
 0x346   :  { %v317_v13 = vsel %vm305_vm2, %v511_v12, %v300_v2 }
 0x347   :  { %318 = vst [vmem:[#allocation7] sm:$0xff] %v317_v13 }
 0x348   :  { %567 = shalt.err (!%p564_p6)
}
 0x349   :  { %s568_s12 = scalar_lea.hbm %s675_s2, 128 }
 0x34a   :  { %p569_p7 = scmp.ne.s32.totalorder %s675_s2, %s568_s12  ;;  %p572_p8 = scmp.lt.u32.totalorder %s568_s12, %s675_s2 }
 0x34c   :  { %p574_p9 = pnand %p572_p8, %p569_p7 }
 0x34e   :  { %577 = shalt.err (!%p574_p9)
}
 0x34f   :  { %328 = dma.vmem_to_hbm [thread:$0]  %s326_s8, 128, %s675_s2, [#allocation4]  }
 0x350   :  { %582 = dma.done.wait [#allocation4], 128  }
 0x351   :  { %583 = vsyncadd [#allocation4], 4294967168 }
 0x352   :  { %332 = vsyncpa [#allocation3], 1 }
 0x353   :  { %333 = vsyncpa [#allocation6], 1 }
 0x354   :  { %334 = vsyncpa [#allocation4], 1 }

</bundles_post_ra>
